<compile_context>
chip_gen: v7x
topology: tpu7x:2x2x1
jax: 0.10.0
libtpu: 0.0.40
codegen_flags: <defaults>
</compile_context>

<pallas_src>
import jax
import jax.numpy as jnp
from jax.experimental import pallas as pl
from jax.experimental.pallas import tpu as pltpu

_SUB = 8      # f32 sublane tile
_LANE = 128   # lane tile


def _focal_val(pred_f32, target_f32, alpha, gamma):
    """Elementwise focal-weighted squared error (f32 in, f32 out)."""
    diff = pred_f32 - target_f32
    mse = diff * diff
    p = jnp.exp(-mse)                      # EUP slot
    omp = 1.0 - p
    # TODO(synk): omp = -jnp.expm1(-mse) is more accurate for tiny |diff|, but
    # the PyTorch reference uses 1 - exp(-mse); keep identical semantics.
    g = float(gamma)
    if g.is_integer() and 0.0 <= g <= 8.0:
        ig = int(g)
        if ig == 0:
            fw = jnp.ones_like(omp)
        else:
            fw = omp
            for _ in range(ig - 1):        # VPU multiply chain
                fw = fw * omp
    else:
        # Guard omp == 0 (pred == target): pow lowers to exp(g * log(omp)).
        fw = jnp.where(omp > 0.0, jnp.power(omp, jnp.float32(g)), 0.0)
    return jnp.float32(alpha) * fw * mse


def _make_kernel(alpha, gamma, block_rows, main_rows, needs_mask):
    """Per-block kernel: focal MSE over one (R, C) tile -> (8, 128) partial."""

    def kernel(pred_ref, target_ref, out_ref):
        x = pred_ref[...].astype(jnp.float32)
        t = target_ref[...].astype(jnp.float32)
        val = _focal_val(x, t, alpha, gamma)
        r, c = val.shape

        if needs_mask:
            # Last block overhangs the array; overhang rows hold unspecified
            # data.  Use a select (not a multiply) so NaN/Inf is discarded.
            limit = main_rows - pl.program_id(0) * block_rows
            row_ids = jax.lax.broadcasted_iota(jnp.int32, (r, c), 0)
            val = jnp.where(row_ids < limit, val, 0.0)

        # Stage 1: fold lane tiles with vreg-aligned slices (VPU adds only).
        acc = val[:, 0:_LANE]
        for k in range(1, c // _LANE):
            acc = acc + val[:, k * _LANE:(k + 1) * _LANE]

        # Stage 2: fold sublane groups onto a single (8, 128) vreg.
        if r % _SUB == 0:
            out_ref[0, :, :] = acc.reshape(r // _SUB, _SUB, _LANE).sum(axis=0)
        else:
            # Small / ragged single-block case: one tiny cross-sublane reduce.
            out_ref[0, :, :] = jnp.zeros((_SUB, _LANE), jnp.float32)
            out_ref[0, 0:1, :] = jnp.sum(acc, axis=0, keepdims=True)

    return kernel


def _vmem_capacity_bytes():
    try:
        cap = getattr(pltpu.get_tpu_info(), "vmem_capacity_bytes", None)
        if cap:
            return int(cap)
    except Exception:
        pass
    return 64 << 20  # conservative: v7x per-TensorCore VMEM


def focal_loss(pred, target, alpha: float = 1.0, gamma: float = 2.0,
               block_rows: int | None = None):
    """Focal-weighted MSE mean via a Pallas TPU kernel.  Returns f32 scalar."""
    assert pred.shape == target.shape, "pred/target shape mismatch"
    total = int(pred.size)
    assert total > 0
    alpha = float(alpha)
    gamma = float(gamma)

    pred_flat = pred.reshape(-1)
    target_flat = target.reshape(-1)
    itemsize = jnp.dtype(pred.dtype).itemsize
    row_align = max(_SUB, 32 // max(1, itemsize))   # 8 f32, 16 bf16, 32 int8

    # Lane-dense 2-D view: widest 128-multiple (<=1024) that divides `total`
    # exactly (free reshape, zero tail); otherwise 128 cols + a <128 tail.
    cols = 0
    for cand in (1024, 512, 256, 128):
        if total >= cand and total % cand == 0:
            cols = cand
            break
    if cols == 0:
        cols = _LANE
    main_rows = total // cols
    main = main_rows * cols
    tail = total - main

    if main_rows == 0:
        # Fewer than 128 elements: not worth a kernel launch.
        return jnp.sum(_focal_val(pred_flat.astype(jnp.float32),
                                  target_flat.astype(jnp.float32),
                                  alpha, gamma)) / jnp.float32(total)

    # Generation-aware tile size: ~4 MiB/input on 128-MiB-VMEM chips
    # (v5e/v6e), ~2 MiB on 64-MiB v7x.
    vmem_cap = _vmem_capacity_bytes()
    target_tile_bytes = (4 << 20) if vmem_cap >= (96 << 20) else (2 << 20)
    if block_rows is None:
        block_rows = max(row_align, target_tile_bytes // (cols * itemsize))
    block_rows = int(block_rows)
    block_rows = max(row_align,
                     (block_rows + row_align - 1) // row_align * row_align)

    if main_rows <= block_rows:
        block_rows_used = main_rows      # one full-dim block: always legal
        needs_mask = False
    else:
        block_rows_used = block_rows     # multiple of row_align (>= 8)
        needs_mask = (main_rows % block_rows_used) != 0
    num_blocks = pl.cdiv(main_rows, block_rows_used)

    def to2d(flat):
        body = flat[:main] if tail else flat   # prefix slice only when ragged
        return body.reshape(main_rows, cols)

    pred2 = to2d(pred_flat)       # native dtype; f32 cast happens in-kernel
    target2 = to2d(target_flat)

    # VMEM limit from actual buffering: 2 inputs x 2 buffers x tile + slack.
    tile_bytes = block_rows_used * cols * itemsize
    vmem_limit = int(min(vmem_cap, max(24 << 20, 4 * tile_bytes + (8 << 20))))

    kernel = _make_kernel(alpha, gamma, block_rows_used, main_rows, needs_mask)

    partials = pl.pallas_call(
        kernel,
        out_shape=jax.ShapeDtypeStruct((num_blocks, _SUB, _LANE), jnp.float32),
        grid_spec=pltpu.PrefetchScalarGridSpec(
            num_scalar_prefetch=0,
            grid=(num_blocks,),
            in_specs=[
                pl.BlockSpec((block_rows_used, cols), lambda i: (i, 0)),
                pl.BlockSpec((block_rows_used, cols), lambda i: (i, 0)),
            ],
            out_specs=pl.BlockSpec((1, _SUB, _LANE), lambda i: (i, 0, 0)),
        ),
        compiler_params=pltpu.CompilerParams(
            # TODO(synk): on v7x, (pltpu.CORE_PARALLEL,) engages both
            # TensorCores; plain "parallel" kept for 1-TC v5e/v6e portability.
            dimension_semantics=("parallel",),
            vmem_limit_bytes=vmem_limit,
        ),
    )(pred2, target2)

    loss_sum = jnp.sum(partials)
    if tail:
        tp = pred_flat[main:].astype(jnp.float32)
        tt = target_flat[main:].astype(jnp.float32)
        loss_sum = loss_sum + jnp.sum(_focal_val(tp, tt, alpha, gamma))
    return loss_sum / jnp.float32(total)


def focal_loss_ref(pred, target, alpha=1.0, gamma=2.0):
    pred = pred.astype(jnp.float32)
    target = target.astype(jnp.float32)
    mse = (pred - target) ** 2
    p = jnp.exp(-mse)
    fw = alpha * (1.0 - p) ** gamma
    return jnp.mean(fw * mse)


if __name__ == "__main__":
    key = jax.random.PRNGKey(0)
    k1, k2 = jax.random.split(key)

    # 1) Aligned size, f32, integer gamma -> single full-rows block path.
    pred = jax.random.normal(k1, (8, 256), dtype=jnp.float32)
    target = jax.random.normal(k2, (8, 256), dtype=jnp.float32)
    loss = jax.block_until_ready(focal_loss(pred, target, alpha=1.0, gamma=2.0))
    ref = focal_loss_ref(pred, target, 1.0, 2.0)
    assert jnp.allclose(loss, ref, rtol=1e-5, atol=1e-6), (loss, ref)

    # 2) Ragged size + non-integer gamma -> wrapper tail + EUP pow path.
    pred_b = jax.random.normal(k1, (3, 70), dtype=jnp.float32)
    target_b = jax.random.normal(k2, (3, 70), dtype=jnp.float32)
    loss_b = jax.block_until_ready(focal_loss(pred_b, target_b, alpha=0.5, gamma=1.5))
    ref_b = focal_loss_ref(pred_b, target_b, 0.5, 1.5)
    assert jnp.allclose(loss_b, ref_b, rtol=1e-5, atol=1e-6), (loss_b, ref_b)

    # 3) Forced multi-block grid with a masked (overhanging) last block.
    pred_c = jax.random.normal(k1, (50, 300), dtype=jnp.float32)
    target_c = jax.random.normal(k2, (50, 300), dtype=jnp.float32)
    loss_c = jax.block_until_ready(
        focal_loss(pred_c, target_c, alpha=1.0, gamma=2.0, block_rows=8))
    ref_c = focal_loss_ref(pred_c, target_c, 1.0, 2.0)
    assert jnp.allclose(loss_c, ref_c, rtol=1e-5, atol=1e-6), (loss_c, ref_c)

    # 4) bf16 inputs (halved HBM traffic; f32 math stays in-kernel).
    pred_d = pred.astype(jnp.bfloat16)
    target_d = target.astype(jnp.bfloat16)
    loss_d = jax.block_until_ready(focal_loss(pred_d, target_d, alpha=1.0, gamma=2.0))
    ref_d = focal_loss_ref(pred_d, target_d, 1.0, 2.0)
    assert jnp.allclose(loss_d, ref_d, rtol=1e-4, atol=1e-5), (loss_d, ref_d)

    print("KERNEL_OK")
</pallas_src>

<mosaic_0001>
module attributes {stable_mosaic.version = 11 : i64} {
  func.func @kernel(%arg0: i32, %arg1: memref<2x1024xf32, #tpu.memory_space<vmem>>, %arg2: memref<2x1024xf32, #tpu.memory_space<vmem>>, %arg3: memref<1x8x128xf32, #tpu.memory_space<vmem>>) attributes {dimension_semantics = [#tpu.dimension_semantics<parallel>], iteration_bounds = array<i64: 1>, scalar_prefetch = 0 : i64, scratch_operands = 0 : i64, tpu.core_type = #tpu.core_type<tc>, window_params = [{transform_indices = @transform_0, window_bounds = array<i64: 2, 1024>}, {transform_indices = @transform_1, window_bounds = array<i64: 2, 1024>}, {transform_indices = @transform_2, window_bounds = array<i64: 1, 8, 128>}]} {
    %c0 = arith.constant 0 : index
    %c0_0 = arith.constant 0 : index
    %0 = vector.load %arg1[%c0, %c0_0] : memref<2x1024xf32, #tpu.memory_space<vmem>>, vector<2x1024xf32>
    %c0_1 = arith.constant 0 : index
    %c0_2 = arith.constant 0 : index
    %1 = vector.load %arg2[%c0_1, %c0_2] : memref<2x1024xf32, #tpu.memory_space<vmem>>, vector<2x1024xf32>
    %2 = arith.subf %0, %1 : vector<2x1024xf32>
    %3 = arith.mulf %2, %2 : vector<2x1024xf32>
    %cst = arith.constant 0.000000e+00 : f32
    %4 = vector.broadcast %cst : f32 to vector<2x1024xf32>
    %5 = arith.subf %4, %3 : vector<2x1024xf32>
    %6 = math.exp %5 : vector<2x1024xf32>
    %cst_3 = arith.constant 1.000000e+00 : f32
    %7 = vector.broadcast %cst_3 : f32 to vector<2x1024xf32>
    %8 = arith.subf %7, %6 : vector<2x1024xf32>
    %9 = arith.mulf %8, %8 : vector<2x1024xf32>
    %cst_4 = arith.constant 1.000000e+00 : f32
    %10 = vector.broadcast %cst_4 : f32 to vector<2x1024xf32>
    %11 = arith.mulf %10, %9 : vector<2x1024xf32>
    %12 = arith.mulf %11, %3 : vector<2x1024xf32>
    %13 = vector.extract_strided_slice %12 {offsets = [0, 0], sizes = [2, 128], strides = [1, 1]} : vector<2x1024xf32> to vector<2x128xf32>
    %14 = vector.extract_strided_slice %12 {offsets = [0, 128], sizes = [2, 128], strides = [1, 1]} : vector<2x1024xf32> to vector<2x128xf32>
    %15 = arith.addf %13, %14 : vector<2x128xf32>
    %16 = vector.extract_strided_slice %12 {offsets = [0, 256], sizes = [2, 128], strides = [1, 1]} : vector<2x1024xf32> to vector<2x128xf32>
    %17 = arith.addf %15, %16 : vector<2x128xf32>
    %18 = vector.extract_strided_slice %12 {offsets = [0, 384], sizes = [2, 128], strides = [1, 1]} : vector<2x1024xf32> to vector<2x128xf32>
    %19 = arith.addf %17, %18 : vector<2x128xf32>
    %20 = vector.extract_strided_slice %12 {offsets = [0, 512], sizes = [2, 128], strides = [1, 1]} : vector<2x1024xf32> to vector<2x128xf32>
    %21 = arith.addf %19, %20 : vector<2x128xf32>
    %22 = vector.extract_strided_slice %12 {offsets = [0, 640], sizes = [2, 128], strides = [1, 1]} : vector<2x1024xf32> to vector<2x128xf32>
    %23 = arith.addf %21, %22 : vector<2x128xf32>
    %24 = vector.extract_strided_slice %12 {offsets = [0, 768], sizes = [2, 128], strides = [1, 1]} : vector<2x1024xf32> to vector<2x128xf32>
    %25 = arith.addf %23, %24 : vector<2x128xf32>
    %26 = vector.extract_strided_slice %12 {offsets = [0, 896], sizes = [2, 128], strides = [1, 1]} : vector<2x1024xf32> to vector<2x128xf32>
    %27 = arith.addf %25, %26 : vector<2x128xf32>
    %cst_5 = arith.constant 0.000000e+00 : f32
    %28 = vector.broadcast %cst_5 : f32 to vector<8x128xf32>
    %c0_6 = arith.constant 0 : index
    %c0_7 = arith.constant 0 : index
    %c0_8 = arith.constant 0 : index
    %29 = vector.load %arg3[%c0_6, %c0_7, %c0_8] : memref<1x8x128xf32, #tpu.memory_space<vmem>>, vector<1x8x128xf32>
    %30 = vector.shape_cast %29 : vector<1x8x128xf32> to vector<8x128xf32>
    %31 = vector.shape_cast %28 : vector<8x128xf32> to vector<1x8x128xf32>
    tpu.vector_store %arg3[%c0_6, %c0_7, %c0_8], %31 {strides = array<i32>} : memref<1x8x128xf32, #tpu.memory_space<vmem>>, vector<1x8x128xf32>,
    %cst_9 = arith.constant dense<0.000000e+00> : vector<128xf32>
    %32 = vector.multi_reduction <add>, %27, %cst_9 [0] : vector<2x128xf32> to vector<128xf32>
    %33 = vector.shape_cast %32 : vector<128xf32> to vector<1x128xf32>
    %c0_10 = arith.constant 0 : index
    %c0_11 = arith.constant 0 : index
    %c0_12 = arith.constant 0 : index
    %34 = vector.load %arg3[%c0_10, %c0_11, %c0_12] : memref<1x8x128xf32, #tpu.memory_space<vmem>>, vector<1x1x128xf32>
    %35 = vector.shape_cast %34 : vector<1x1x128xf32> to vector<1x128xf32>
    %36 = vector.shape_cast %33 : vector<1x128xf32> to vector<1x1x128xf32>
    tpu.vector_store %arg3[%c0_10, %c0_11, %c0_12], %36 {strides = array<i32>} : memref<1x8x128xf32, #tpu.memory_space<vmem>>, vector<1x1x128xf32>,
    return
  }
  func.func @transform_0(%arg0: i32) -> (i32, i32) {
    %c0_i32 = arith.constant 0 : i32
    %c0_i32_0 = arith.constant 0 : i32
    return %arg0, %c0_i32 : i32, i32
  }
  func.func @transform_1(%arg0: i32) -> (i32, i32) {
    %c0_i32 = arith.constant 0 : i32
    %c0_i32_0 = arith.constant 0 : i32
    return %arg0, %c0_i32 : i32, i32
  }
  func.func @transform_2(%arg0: i32) -> (i32, i32, i32) {
    %c0_i32 = arith.constant 0 : i32
    %c0_i32_0 = arith.constant 0 : i32
    %c0_i32_1 = arith.constant 0 : i32
    return %arg0, %c0_i32, %c0_i32_0 : i32, i32, i32
  }
}

</mosaic_0001>

<bundles_post_ra>
// kernel: tpu_custom_call.1
= control target key start
LH: loop header
LB: loop body
LE: loop exit
PB: predicated region body
PF: predicated region fallthrough
CT: control target
= control target key end

     0   :  { %7 = vsyncpa [#allocation3], 0  ;;  %s238_s0 = inlined_call_operand.hbm [shape: f32[2,1024], index: 0, kind: input, shape index: {}]   ;;  %s239_s1 = inlined_call_operand.hbm [shape: f32[2,1024], index: 1, kind: input, shape index: {}]   ;;  %s240_s2 = inlined_call_operand.hbm [shape: f32[1,8,128], index: 2, kind: output, shape index: {}]  }
   0x1   :  { %8 = vsyncpa [#allocation6], 0 }
   0x2   :  { %9 = vsyncpa [#allocation4], 0  ;;  %s183_s9 = smov [#allocation2]   ;;  %s184_s11 = smov [#allocation5]  }
   0x3   :  { %s16_s10 = sshll.u32 %s183_s9, 4  ;;  %s26_s12 = sshll.u32 %s184_s11, 4  ;;  %s17_s10 = int_to_ptr.vmem [resolvable:$true] %s16_s10  ;;  %s27_s12 = int_to_ptr.vmem [resolvable:$true] %s26_s12 }
   0x4   :  { %s111_s15 = scalar_lea.hbm %s238_s0, 256 }
   0x5   :  { %p112_p0 = scmp.ne.s32.totalorder %s238_s0, %s111_s15  ;;  %p115_p1 = scmp.lt.u32.totalorder %s111_s15, %s238_s0 }
   0x7   :  { %p117_p2 = pnand %p115_p1, %p112_p0 }
   0x9   :  { %120 = shalt.err (!%p117_p2)
}
   0xa   :  { %s121_s20 = scalar_lea.vmem %s17_s10, 256  ;;  %p126_p4 = scmp.lt.s32.totalorder %s17_s10, %s17_s10 }
   0xb   :  { %p122_p3 = scmp.ne.s32.totalorder %s17_s10, %s121_s20  ;;  %p127_p5 = scmp.lt.s32.totalorder %s121_s20, %s121_s20 }
   0xd   :  { %p128_p6 = por %p127_p5, %p126_p4 }
   0xf   :  { %p129_p7 = pnand %p128_p6, %p122_p3 }
  0x11   :  { %132 = shalt.err (!%p129_p7)
}
  0x12   :  { %19 = dma.hbm_to_vmem [thread:$0]  %s238_s0, 256, %s17_s10, [#allocation3]  }
  0x13   :  { %s133_s25 = scalar_lea.hbm %s239_s1, 256 }
  0x14   :  { %p134_p8 = scmp.ne.s32.totalorder %s239_s1, %s133_s25  ;;  %p137_p9 = scmp.lt.u32.totalorder %s133_s25, %s239_s1 }
  0x16   :  { %p139_p10 = pnand %p137_p9, %p134_p8 }
  0x18   :  { %142 = shalt.err (!%p139_p10)
}
  0x19   :  { %s143_s30 = scalar_lea.vmem %s27_s12, 256  ;;  %p148_p12 = scmp.lt.s32.totalorder %s27_s12, %s27_s12 }
  0x1a   :  { %p144_p11 = scmp.ne.s32.totalorder %s27_s12, %s143_s30  ;;  %p149_p13 = scmp.lt.s32.totalorder %s143_s30, %s143_s30 }
  0x1c   :  { %p150_p0 = por %p149_p13, %p148_p12 }
  0x1e   :  { %p151_p1 = pnand %p150_p0, %p144_p11 }
  0x20   :  { %154 = shalt.err (!%p151_p1)
}
  0x21   :  { %29 = dma.hbm_to_vmem [thread:$0]  %s239_s1, 256, %s27_s12, [#allocation6]  }
  0x22   :  { %177 = dma.done.wait [#allocation3], 256  }
  0x23   :  { %178 = vsyncadd [#allocation3], 4294967040 }
  0x24   :  { %179 = dma.done.wait [#allocation6], 256  }
  0x25   :  { %180 = vsyncadd [#allocation6], 4294967040  ;;  %v185_v0 = vmov 0.0   ;;  %v36_v1 = vld [vmem:[#allocation2] sm:$0xff]  ;;  %v37_v2 = vld [vmem:[#allocation2 + $0x8] sm:$0xff]  ;;  %vm78_vm0 = vcmask 1041408  }
  0x26   :  { %77 = vst [vmem:[#allocation7] sm:$0xff] %v185_v0  ;;  %v38_v3 = vld [vmem:[#allocation5] sm:$0xff]  ;;  %v39_v4 = vld [vmem:[#allocation5 + $0x8] sm:$0xff]  ;;  %s186_s1 = smov [#allocation7]  }
  0x27   :  { %v40_v5 = vsub.f32 %v36_v1, %v38_v3  ;;  %v41_v6 = vsub.f32 %v37_v2, %v39_v4  ;;  %s93_s4 = sshll.u32 %s186_s1, 4  ;;  %s94_s4 = int_to_ptr.vmem [resolvable:$true] %s93_s4 }
  0x28   :  { %s155_s5 = scalar_lea.vmem %s94_s4, 128  ;;  %p160_p3 = scmp.lt.s32.totalorder %s94_s4, %s94_s4 }
  0x29   :  { %v42_v7 = vmul.f32 %v40_v5, %v40_v5  ;;  %v43_v8 = vmul.f32 %v41_v6, %v41_v6  ;;  %p156_p2 = scmp.ne.s32.totalorder %s94_s4, %s155_s5  ;;  %p161_p4 = scmp.lt.s32.totalorder %s155_s5, %s155_s5 }
  0x2b   :  { %v44_v9 = vsub.f32 0.0, %v42_v7  ;;  %v45_v10 = vsub.f32 0.0, %v43_v8  ;;  %p162_p5 = por %p161_p4, %p160_p3 }
  0x2d   :  { %v46_v11 = vmul.f32 1.442695, %v44_v9  ;;  %v48_v12 = vmul.f32 1.442695, %v45_v10  ;;  %p163_p6 = pnand %p162_p5, %p156_p2 }
  0x2f   :  { %107 = vpow2.f32 %v46_v11 }
  0x30   :  { %109 = vpow2.f32 %v48_v12 }
  0x39   :  { %v108_v13 = vpop.eup %107 }
  0x3a   :  { %v110_v14 = vpop.eup %109  ;;  %v50_v15 = vsub.f32 1.0, %v108_v13 }
  0x3b   :  { %v51_v16 = vsub.f32 1.0, %v110_v14 }
  0x3c   :  { %v52_v17 = vmul.f32 %v50_v15, %v50_v15 }
  0x3d   :  { %v53_v18 = vmul.f32 %v51_v16, %v51_v16 }
  0x3e   :  { %v54_v19 = vmul.f32 %v52_v17, %v42_v7 }
  0x3f   :  { %v55_v22 = vmul.f32 %v53_v18, %v43_v8 }
  0x40   :  { %v57_v20 = vrot.slane %v54_v19, 2  ;;  %v60_v21 = vrot.slane %v54_v19, 4  ;;  %v63_v24 = vrot.slane %v54_v19, 6 }
  0x41   :  { %v68_v27 = vrot.slane %v55_v22, 2  ;;  %v71_v29 = vrot.slane %v55_v22, 4  ;;  %v74_v31 = vrot.slane %v55_v22, 6 }
  0x42   :  { %v59_v23 = vadd.f32 %v57_v20, %v54_v19 }
  0x44   :  { %v62_v25 = vadd.f32 %v60_v21, %v59_v23 }
  0x46   :  { %v65_v26 = vadd.f32 %v63_v24, %v62_v25 }
  0x48   :  { %v66_v28 = vadd.f32 %v65_v26, %v55_v22 }
  0x4a   :  { %v70_v30 = vadd.f32 %v68_v27, %v66_v28 }
  0x4c   :  { %v73_v32 = vadd.f32 %v71_v29, %v70_v30 }
  0x4e   :  { %v76_v33 = vadd.f32 %v74_v31, %v73_v32 }
  0x50   :  { %v79_v34 = vsel %vm78_vm0, %v76_v33, 0.0 }
  0x51   :  { %v80_v35 = vrot.slane %v79_v34, 4 }
  0x53   :  { %v81_v36 = vadd.f32 %v80_v35, %v79_v34 }
  0x55   :  { %v82_v37 = vrot.slane %v81_v36, 2 }
  0x57   :  { %v83_v38 = vadd.f32 %v82_v37, %v81_v36 }
  0x59   :  { %v84_v39 = vrot.slane %v83_v38, 1 }
  0x5b   :  { %v85_v40 = vadd.f32 %v84_v39, %v83_v38 }
  0x5d   :  { %86 = vst [vmem:[#allocation7] sm:$0x1] %v85_v40 }
  0x5e   :  { %166 = shalt.err (!%p163_p6)
}
  0x5f   :  { %s167_s8 = scalar_lea.hbm %s240_s2, 128 }
  0x60   :  { %p168_p7 = scmp.ne.s32.totalorder %s240_s2, %s167_s8  ;;  %p171_p8 = scmp.lt.u32.totalorder %s167_s8, %s240_s2 }
  0x62   :  { %p173_p9 = pnand %p171_p8, %p168_p7 }
  0x64   :  { %176 = shalt.err (!%p173_p9)
}
  0x65   :  { %96 = dma.vmem_to_hbm [thread:$0]  %s94_s4, 128, %s240_s2, [#allocation4]  }
  0x66   :  { %181 = dma.done.wait [#allocation4], 128  }
  0x67   :  { %182 = vsyncadd [#allocation4], 4294967168 }
  0x68   :  { %100 = vsyncpa [#allocation3], 1 }
  0x69   :  { %101 = vsyncpa [#allocation6], 1 }
  0x6a   :  { %102 = vsyncpa [#allocation4], 1 }

</bundles_post_ra>
